<compile_context>
chip_gen: v7x
topology: tpu7x:2x2x1
jax: 0.10.0
libtpu: 0.0.40
codegen_flags: <defaults>
</compile_context>

<pallas_src>
import math

import numpy as np
import jax
import jax.numpy as jnp
from jax import lax
from jax.experimental import pallas as pl
from jax.experimental.pallas import tpu as pltpu

_LANE = 128                       # vreg lane width
_SUBLANE = 8                      # f32 vreg sublane height
_CHAIN_LEN = 5                    # dictionary points per geometric-recurrence chain
_TARGET_BLOCK_ELEMS = 512 * 1024  # ~2 MiB f32 per operand block
_MIN_GRID_BLOCKS = 8              # give both v7x TensorCores (and the pipeline) work


def _make_dictionary(D: int, boundary: float):
    """Matches KAF.__init__: dict, interval, sigma, gamma."""
    dict_np = np.linspace(-boundary, boundary, D).astype(np.float32)
    interval = np.float32(dict_np[1] - dict_np[0]) if D > 1 else np.float32(1.0)
    sigma = np.float32(2.0) * interval
    gamma = np.float32(0.5) / np.square(sigma)
    return dict_np, float(gamma)


def _round_up(n: int, m: int) -> int:
    return ((n + m - 1) // m) * m


def _choose_tiles(rows: int, cols: int,
                  target_elems: int = _TARGET_BLOCK_ELEMS,
                  min_blocks: int = _MIN_GRID_BLOCKS):
    """Pick (row_tile, col_tile) for the grid blocks.

    Callers guarantee rows % 8 == 0 and cols % 128 == 0.  Blocks target
    ~target_elems f32 (~2 MiB): big enough to amortize the ~0.35us/step
    pipeline overhead, small enough that double-buffered in+out stays far
    below v7x's 64 MiB VMEM.  The row tile is additionally capped so the grid
    has >= min_blocks steps when the problem allows (2 TensorCores on v7x).
    """
    max_cols = max(_LANE, (target_elems // _SUBLANE) // _LANE * _LANE)
    col_tile = cols if cols <= max_cols else max_cols
    max_rows = max(_SUBLANE, (target_elems // col_tile) // _SUBLANE * _SUBLANE)
    rows_for_min_blocks = max(_SUBLANE, _round_up(-(-rows // min_blocks), _SUBLANE))
    row_tile = min(max_rows, rows_for_min_blocks)
    if row_tile >= rows:
        row_tile = rows
    return row_tile, col_tile


def _choose_lane_chunk(col_tile: int) -> int:
    """Largest of 512/256/128 dividing the block width (block width % 128 == 0)."""
    for lc in (512, 256, 128):
        if col_tile % lc == 0:
            return lc
    return _LANE


def _make_kaf_kernel(dict_np, gamma: float, D: int, coeff_axis: int,
                     block_rows: int, block_cols: int, lane_chunk: int,
                     row_chunk: int = _SUBLANE, chain_len: int = _CHAIN_LEN):
    """KAF kernel over one (block_rows, block_cols) VMEM tile.

    coeff_axis == 0: alpha block is (block_rows, D); coefficient varies per
                     sublane row (4D NCHW path: one channel per row).
    coeff_axis == 1: alpha block is (D, block_cols); coefficient varies per
                     lane column (2D (B,C) path: channels packed along lanes).
    """
    assert block_rows % row_chunk == 0 and block_cols % lane_chunk == 0
    k1 = [float(2.0 * gamma * float(u)) for u in dict_np]   # 2*gamma*u_d
    step = k1[1] - k1[0] if D > 1 else 0.0                   # 2*gamma*interval
    neg_gamma = float(-gamma)
    seeds = list(range(0, D, chain_len))
    n_row_chunks = block_rows // row_chunk
    n_lane_chunks = block_cols // lane_chunk

    def kernel(alpha_ref, x_ref, o_ref):

        def process_chunk(r0, c0, a_rows):
            x = x_ref[pl.ds(r0, row_chunk), pl.ds(c0, lane_chunk)].astype(jnp.float32)

            def coeff(d):
                if coeff_axis == 0:
                    return a_rows[:, d:d + 1]                         # (rc, 1) hoisted load
                # Per-d ref slice (loads have slack; keeping (D, lc) live would
                # cost ~12 extra vregs inside the chunk loop).
                return alpha_ref[d:d + 1, pl.ds(c0, lane_chunk)]      # (1, lc)

            e0 = (neg_gamma * x) * x                                  # -gamma*x^2
            # Ratio between consecutive dictionary terms.  Clipped so that a
            # (physically irrelevant, |x| > ~100) overflow can never turn a
            # zero-seeded chain into NaN via 0*inf.
            r = jnp.exp(jnp.clip(step * x, -80.0, 80.0)) if D > 1 else None
            es = [jnp.exp(e0 + k1[s] * x) for s in seeds]             # chain seeds
            acc = [None, None]                                        # 2 accumulators

            def add(slot, term):
                acc[slot] = term if acc[slot] is None else acc[slot] + term

            for i, s in enumerate(seeds):
                add(i % 2, coeff(s) * es[i])
            for off in range(1, chain_len):                           # walk chains in lockstep (ILP)
                for i, s in enumerate(seeds):
                    d = s + off
                    if d < D:
                        es[i] = es[i] * r
                        add(i % 2, coeff(d) * es[i])
            total = acc[0] if acc[1] is None else acc[0] + acc[1]
            o_ref[pl.ds(r0, row_chunk), pl.ds(c0, lane_chunk)] = total.astype(o_ref.dtype)

        def row_body(ri):
            if isinstance(ri, int):
                r0 = ri * row_chunk
            else:
                r0 = pl.multiple_of(ri * row_chunk, row_chunk)
            # Hoist the per-row-chunk alpha load (one <=1-vreg (rc, D) slice)
            # out of the D loop and the lane loop.
            a_rows = alpha_ref[pl.ds(r0, row_chunk), :] if coeff_axis == 0 else None

            def lane_body(ci, carry):
                if isinstance(ci, int):
                    c0 = ci * lane_chunk
                else:
                    c0 = pl.multiple_of(ci * lane_chunk, lane_chunk)
                process_chunk(r0, c0, a_rows)
                return carry

            if n_lane_chunks == 1:
                lane_body(0, 0)
            else:
                lax.fori_loop(0, n_lane_chunks, lane_body, 0)

        def row_loop_body(ri, carry):
            row_body(ri)
            return carry

        if n_row_chunks == 1:
            row_body(0)
        else:
            lax.fori_loop(0, n_row_chunks, row_loop_body, 0)

    return kernel


def _run_kaf(xv, alpha_arr, dict_np, gamma, D, coeff_axis, out_dtype):
    rows, cols = xv.shape                     # rows % 8 == 0, cols % 128 == 0
    row_tile, col_tile = _choose_tiles(rows, cols)
    lane_chunk = _choose_lane_chunk(col_tile)
    kernel = _make_kaf_kernel(dict_np, gamma, D, coeff_axis,
                              block_rows=row_tile, block_cols=col_tile,
                              lane_chunk=lane_chunk)
    grid = (pl.cdiv(rows, row_tile), pl.cdiv(cols, col_tile))
    if coeff_axis == 0:
        alpha_spec = pl.BlockSpec((row_tile, D), lambda i, j: (i, 0))
    else:
        alpha_spec = pl.BlockSpec((D, col_tile), lambda i, j: (0, j))

    n_exp = len(range(0, D, _CHAIN_LEN)) + (1 if D > 1 else 0)
    total = rows * cols
    cost = pl.CostEstimate(
        flops=(3 * D + 10) * total,
        transcendentals=n_exp * total,
        bytes_accessed=2 * 4 * total + 4 * int(np.prod(alpha_arr.shape)))

    return pl.pallas_call(
        kernel,
        out_shape=jax.ShapeDtypeStruct((rows, cols), out_dtype),
        grid=grid,
        in_specs=[alpha_spec,
                  pl.BlockSpec((row_tile, col_tile), lambda i, j: (i, j))],
        out_specs=pl.BlockSpec((row_tile, col_tile), lambda i, j: (i, j)),
        compiler_params=pltpu.CompilerParams(
            dimension_semantics=("parallel", "parallel"),
            vmem_limit_bytes=32 * 1024 * 1024),
        cost_estimate=cost,
    )(alpha_arr, xv)


def _kaf_forward_impl(x, alpha, D=20, boundary=3.0):
    """KAF forward.  x: (N,C,H,W) or (B,C);  alpha: (1, C, D)."""
    dict_np, gamma = _make_dictionary(D, boundary)
    # Fold the constant exp(-gamma*u_d^2) factor into alpha (wrapper-side, tiny)
    # so the kernel only evaluates exp(-gamma*x^2 + 2*gamma*u_d*x).
    fold = np.exp(-gamma * dict_np.astype(np.float64) ** 2).astype(np.float32)
    C = alpha.shape[1]
    alpha_fold = alpha.reshape(C, D).astype(jnp.float32) * jnp.asarray(fold)[None, :]

    if x.ndim == 4:
        N, Cx, H, W = x.shape
        assert Cx == C, "channel count of x must match alpha"
        NC, HW = N * C, H * W
        NCp, HWp = _round_up(NC, _SUBLANE), _round_up(HW, _LANE)
        x2 = x.reshape(NC, HW)                         # free view of contiguous NCHW
        if (NCp, HWp) != (NC, HW):
            # Pad to full (8,128) tiles so stores stay unmasked, lane-dense vst.
            x2 = jnp.pad(x2, ((0, NCp - NC), (0, HWp - HW)))
        alpha_rows = jnp.broadcast_to(alpha_fold[None], (N, C, D)).reshape(NC, D)
        if NCp != NC:
            alpha_rows = jnp.pad(alpha_rows, ((0, NCp - NC), (0, 0)))
        out = _run_kaf(x2, alpha_rows, dict_np, gamma, D, coeff_axis=0,
                       out_dtype=x.dtype)
        if (NCp, HWp) != (NC, HW):
            out = out[:NC, :HW]
        return out.reshape(N, C, H, W)

    if x.ndim == 2:
        B, Cx = x.shape
        assert Cx == C, "channel count of x must match alpha"
        alpha_t = alpha_fold.T                          # (D, C)
        undo = None
        if C % _LANE == 0:
            xv, av, rows = x, alpha_t, B
        elif C < _LANE:
            # Lane-dense repack: put G batch rows side by side so every lane of
            # a row is used (channel of lane j is j % C); avoids the masked
            # partial stores a (B, C<128) layout would emit.
            L = (C * _LANE) // math.gcd(C, _LANE)       # lcm(C, 128)
            G = L // C
            Bp = _round_up(B, G)
            xp = jnp.pad(x, ((0, Bp - B), (0, 0))) if Bp > B else x
            xv = xp.reshape(Bp // G, L)
            av = jnp.tile(alpha_t, (1, G))              # (D, L): column j -> channel j % C
            rows = Bp // G
            undo = ("packed", Bp, G)
        else:
            Cp = _round_up(C, _LANE)
            xv = jnp.pad(x, ((0, 0), (0, Cp - C)))
            av = jnp.pad(alpha_t, ((0, 0), (0, Cp - C)))
            rows = B
            undo = ("lanepad", Cp)
        rows_p = _round_up(rows, _SUBLANE)
        if rows_p > rows:
            xv = jnp.pad(xv, ((0, rows_p - rows), (0, 0)))
        out = _run_kaf(xv, av, dict_np, gamma, D, coeff_axis=1, out_dtype=x.dtype)
        out = out[:rows]
        if undo is None:
            return out
        if undo[0] == "packed":
            _, Bp, _G = undo
            return out.reshape(Bp, C)[:B]
        return out[:, :C]

    raise ValueError(f"KAF expects a 2-D or 4-D input, got shape {x.shape}")


kaf_forward = jax.jit(_kaf_forward_impl, static_argnames=("D", "boundary"))


def kaf_reference(x, alpha, D=20, boundary=3.0):
    """Pure-JAX reference mirroring the PyTorch forward."""
    dict_np, gamma = _make_dictionary(D, boundary)
    d = jnp.asarray(dict_np)
    C = alpha.shape[1]
    K = jnp.exp(-gamma * (x[..., None] - d) ** 2)
    if x.ndim == 4:
        a = alpha.reshape(1, C, 1, 1, D)
    else:
        a = alpha.reshape(1, C, D)
    return jnp.sum(K * a, axis=-1)


if __name__ == "__main__":
    D, boundary = 20, 3.0
    key = jax.random.PRNGKey(0)
    ka1, ka2, kb1, kb2, kc1 = jax.random.split(key, 5)

    # 4-D conv-feature-map case (NCHW), (8,128)-aligned shapes.
    N, C, H, W = 2, 4, 16, 16
    x4 = jax.random.normal(ka1, (N, C, H, W), dtype=jnp.float32)
    # reset_parameters(): alpha ~ Normal(0, 0.3), shape (1, num_parameters, D)
    alpha = 0.3 * jax.random.normal(ka2, (1, C, D), dtype=jnp.float32)
    y4 = jax.block_until_ready(kaf_forward(x4, alpha, D=D, boundary=boundary))
    y4_ref = kaf_reference(x4, alpha, D=D, boundary=boundary)
    np.testing.assert_allclose(np.asarray(y4), np.asarray(y4_ref), rtol=1e-4, atol=1e-4)

    # 4-D case whose channel / spatial extents need (8,128) padding.
    N2, C2, H2, W2 = 2, 3, 7, 7
    x4b = jax.random.normal(kb1, (N2, C2, H2, W2), dtype=jnp.float32)
    alphab = 0.3 * jax.random.normal(kb2, (1, C2, D), dtype=jnp.float32)
    y4b = jax.block_until_ready(kaf_forward(x4b, alphab, D=D, boundary=boundary))
    y4b_ref = kaf_reference(x4b, alphab, D=D, boundary=boundary)
    np.testing.assert_allclose(np.asarray(y4b), np.asarray(y4b_ref), rtol=1e-4, atol=1e-4)

    # 2-D linear-layer case (B, C) with C < 128 -> lane-dense repack.
    B = 8
    x2 = jax.random.normal(kc1, (B, C), dtype=jnp.float32)
    y2 = jax.block_until_ready(kaf_forward(x2, alpha, D=D, boundary=boundary))
    y2_ref = kaf_reference(x2, alpha, D=D, boundary=boundary)
    np.testing.assert_allclose(np.asarray(y2), np.asarray(y2_ref), rtol=1e-4, atol=1e-4)

    print("KERNEL_OK")
</pallas_src>

<mosaic_0001>
module attributes {stable_mosaic.version = 11 : i64} {
  func.func @kernel(%arg0: i32, %arg1: i32, %arg2: memref<8x20xf32, #tpu.memory_space<vmem>>, %arg3: memref<8x256xf32, #tpu.memory_space<vmem>>, %arg4: memref<8x256xf32, #tpu.memory_space<vmem>>) attributes {dimension_semantics = [#tpu.dimension_semantics<parallel>, #tpu.dimension_semantics<parallel>], iteration_bounds = array<i64: 1, 1>, scalar_prefetch = 0 : i64, scratch_operands = 0 : i64, tpu.core_type = #tpu.core_type<tc>, window_params = [{transform_indices = @transform_0, window_bounds = array<i64: 8, 20>}, {transform_indices = @transform_1, window_bounds = array<i64: 8, 256>}, {transform_indices = @transform_2, window_bounds = array<i64: 8, 256>}]} {
    %c0 = arith.constant 0 : index
    %c0_0 = arith.constant 0 : index
    %0 = vector.load %arg2[%c0, %c0_0] : memref<8x20xf32, #tpu.memory_space<vmem>>, vector<8x20xf32>
    %c0_1 = arith.constant 0 : index
    %c0_2 = arith.constant 0 : index
    %1 = vector.load %arg3[%c0_1, %c0_2] : memref<8x256xf32, #tpu.memory_space<vmem>>, vector<8x256xf32>
    %cst = arith.constant -1.25347233 : f32
    %2 = vector.broadcast %cst : f32 to vector<8x256xf32>
    %3 = arith.mulf %2, %1 : vector<8x256xf32>
    %4 = arith.mulf %3, %1 : vector<8x256xf32>
    %cst_3 = arith.constant 0.791666686 : f32
    %5 = vector.broadcast %cst_3 : f32 to vector<8x256xf32>
    %6 = arith.mulf %5, %1 : vector<8x256xf32>
    %cst_4 = arith.constant -8.000000e+01 : f32
    %cst_5 = arith.constant 8.000000e+01 : f32
    %7 = vector.broadcast %cst_4 : f32 to vector<8x256xf32>
    %8 = arith.maximumf %7, %6 : vector<8x256xf32>
    %9 = vector.broadcast %cst_5 : f32 to vector<8x256xf32>
    %10 = arith.minimumf %9, %8 : vector<8x256xf32>
    %11 = math.exp %10 : vector<8x256xf32>
    %cst_6 = arith.constant -7.52083396 : f32
    %12 = vector.broadcast %cst_6 : f32 to vector<8x256xf32>
    %13 = arith.mulf %12, %1 : vector<8x256xf32>
    %14 = arith.addf %4, %13 : vector<8x256xf32>
    %15 = math.exp %14 : vector<8x256xf32>
    %cst_7 = arith.constant -3.56250024 : f32
    %16 = vector.broadcast %cst_7 : f32 to vector<8x256xf32>
    %17 = arith.mulf %16, %1 : vector<8x256xf32>
    %18 = arith.addf %4, %17 : vector<8x256xf32>
    %19 = math.exp %18 : vector<8x256xf32>
    %cst_8 = arith.constant 0.395833343 : f32
    %20 = vector.broadcast %cst_8 : f32 to vector<8x256xf32>
    %21 = arith.mulf %20, %1 : vector<8x256xf32>
    %22 = arith.addf %4, %21 : vector<8x256xf32>
    %23 = math.exp %22 : vector<8x256xf32>
    %cst_9 = arith.constant 4.35416698 : f32
    %24 = vector.broadcast %cst_9 : f32 to vector<8x256xf32>
    %25 = arith.mulf %24, %1 : vector<8x256xf32>
    %26 = arith.addf %4, %25 : vector<8x256xf32>
    %27 = math.exp %26 : vector<8x256xf32>
    %28 = vector.extract_strided_slice %0 {offsets = [0, 0], sizes = [8, 1], strides = [1, 1]} : vector<8x20xf32> to vector<8x1xf32>
    %29 = vector.broadcast %28 : vector<8x1xf32> to vector<8x256xf32>
    %30 = arith.mulf %29, %15 : vector<8x256xf32>
    %31 = vector.extract_strided_slice %0 {offsets = [0, 5], sizes = [8, 1], strides = [1, 1]} : vector<8x20xf32> to vector<8x1xf32>
    %32 = vector.broadcast %31 : vector<8x1xf32> to vector<8x256xf32>
    %33 = arith.mulf %32, %19 : vector<8x256xf32>
    %34 = vector.extract_strided_slice %0 {offsets = [0, 10], sizes = [8, 1], strides = [1, 1]} : vector<8x20xf32> to vector<8x1xf32>
    %35 = vector.broadcast %34 : vector<8x1xf32> to vector<8x256xf32>
    %36 = arith.mulf %35, %23 : vector<8x256xf32>
    %37 = arith.addf %30, %36 : vector<8x256xf32>
    %38 = vector.extract_strided_slice %0 {offsets = [0, 15], sizes = [8, 1], strides = [1, 1]} : vector<8x20xf32> to vector<8x1xf32>
    %39 = vector.broadcast %38 : vector<8x1xf32> to vector<8x256xf32>
    %40 = arith.mulf %39, %27 : vector<8x256xf32>
    %41 = arith.addf %33, %40 : vector<8x256xf32>
    %42 = arith.mulf %15, %11 : vector<8x256xf32>
    %43 = vector.extract_strided_slice %0 {offsets = [0, 1], sizes = [8, 1], strides = [1, 1]} : vector<8x20xf32> to vector<8x1xf32>
    %44 = vector.broadcast %43 : vector<8x1xf32> to vector<8x256xf32>
    %45 = arith.mulf %44, %42 : vector<8x256xf32>
    %46 = arith.addf %37, %45 : vector<8x256xf32>
    %47 = arith.mulf %19, %11 : vector<8x256xf32>
    %48 = vector.extract_strided_slice %0 {offsets = [0, 6], sizes = [8, 1], strides = [1, 1]} : vector<8x20xf32> to vector<8x1xf32>
    %49 = vector.broadcast %48 : vector<8x1xf32> to vector<8x256xf32>
    %50 = arith.mulf %49, %47 : vector<8x256xf32>
    %51 = arith.addf %41, %50 : vector<8x256xf32>
    %52 = arith.mulf %23, %11 : vector<8x256xf32>
    %53 = vector.extract_strided_slice %0 {offsets = [0, 11], sizes = [8, 1], strides = [1, 1]} : vector<8x20xf32> to vector<8x1xf32>
    %54 = vector.broadcast %53 : vector<8x1xf32> to vector<8x256xf32>
    %55 = arith.mulf %54, %52 : vector<8x256xf32>
    %56 = arith.addf %46, %55 : vector<8x256xf32>
    %57 = arith.mulf %27, %11 : vector<8x256xf32>
    %58 = vector.extract_strided_slice %0 {offsets = [0, 16], sizes = [8, 1], strides = [1, 1]} : vector<8x20xf32> to vector<8x1xf32>
    %59 = vector.broadcast %58 : vector<8x1xf32> to vector<8x256xf32>
    %60 = arith.mulf %59, %57 : vector<8x256xf32>
    %61 = arith.addf %51, %60 : vector<8x256xf32>
    %62 = arith.mulf %42, %11 : vector<8x256xf32>
    %63 = vector.extract_strided_slice %0 {offsets = [0, 2], sizes = [8, 1], strides = [1, 1]} : vector<8x20xf32> to vector<8x1xf32>
    %64 = vector.broadcast %63 : vector<8x1xf32> to vector<8x256xf32>
    %65 = arith.mulf %64, %62 : vector<8x256xf32>
    %66 = arith.addf %56, %65 : vector<8x256xf32>
    %67 = arith.mulf %47, %11 : vector<8x256xf32>
    %68 = vector.extract_strided_slice %0 {offsets = [0, 7], sizes = [8, 1], strides = [1, 1]} : vector<8x20xf32> to vector<8x1xf32>
    %69 = vector.broadcast %68 : vector<8x1xf32> to vector<8x256xf32>
    %70 = arith.mulf %69, %67 : vector<8x256xf32>
    %71 = arith.addf %61, %70 : vector<8x256xf32>
    %72 = arith.mulf %52, %11 : vector<8x256xf32>
    %73 = vector.extract_strided_slice %0 {offsets = [0, 12], sizes = [8, 1], strides = [1, 1]} : vector<8x20xf32> to vector<8x1xf32>
    %74 = vector.broadcast %73 : vector<8x1xf32> to vector<8x256xf32>
    %75 = arith.mulf %74, %72 : vector<8x256xf32>
    %76 = arith.addf %66, %75 : vector<8x256xf32>
    %77 = arith.mulf %57, %11 : vector<8x256xf32>
    %78 = vector.extract_strided_slice %0 {offsets = [0, 17], sizes = [8, 1], strides = [1, 1]} : vector<8x20xf32> to vector<8x1xf32>
    %79 = vector.broadcast %78 : vector<8x1xf32> to vector<8x256xf32>
    %80 = arith.mulf %79, %77 : vector<8x256xf32>
    %81 = arith.addf %71, %80 : vector<8x256xf32>
    %82 = arith.mulf %62, %11 : vector<8x256xf32>
    %83 = vector.extract_strided_slice %0 {offsets = [0, 3], sizes = [8, 1], strides = [1, 1]} : vector<8x20xf32> to vector<8x1xf32>
    %84 = vector.broadcast %83 : vector<8x1xf32> to vector<8x256xf32>
    %85 = arith.mulf %84, %82 : vector<8x256xf32>
    %86 = arith.addf %76, %85 : vector<8x256xf32>
    %87 = arith.mulf %67, %11 : vector<8x256xf32>
    %88 = vector.extract_strided_slice %0 {offsets = [0, 8], sizes = [8, 1], strides = [1, 1]} : vector<8x20xf32> to vector<8x1xf32>
    %89 = vector.broadcast %88 : vector<8x1xf32> to vector<8x256xf32>
    %90 = arith.mulf %89, %87 : vector<8x256xf32>
    %91 = arith.addf %81, %90 : vector<8x256xf32>
    %92 = arith.mulf %72, %11 : vector<8x256xf32>
    %93 = vector.extract_strided_slice %0 {offsets = [0, 13], sizes = [8, 1], strides = [1, 1]} : vector<8x20xf32> to vector<8x1xf32>
    %94 = vector.broadcast %93 : vector<8x1xf32> to vector<8x256xf32>
    %95 = arith.mulf %94, %92 : vector<8x256xf32>
    %96 = arith.addf %86, %95 : vector<8x256xf32>
    %97 = arith.mulf %77, %11 : vector<8x256xf32>
    %98 = vector.extract_strided_slice %0 {offsets = [0, 18], sizes = [8, 1], strides = [1, 1]} : vector<8x20xf32> to vector<8x1xf32>
    %99 = vector.broadcast %98 : vector<8x1xf32> to vector<8x256xf32>
    %100 = arith.mulf %99, %97 : vector<8x256xf32>
    %101 = arith.addf %91, %100 : vector<8x256xf32>
    %102 = arith.mulf %82, %11 : vector<8x256xf32>
    %103 = vector.extract_strided_slice %0 {offsets = [0, 4], sizes = [8, 1], strides = [1, 1]} : vector<8x20xf32> to vector<8x1xf32>
    %104 = vector.broadcast %103 : vector<8x1xf32> to vector<8x256xf32>
    %105 = arith.mulf %104, %102 : vector<8x256xf32>
    %106 = arith.addf %96, %105 : vector<8x256xf32>
    %107 = arith.mulf %87, %11 : vector<8x256xf32>
    %108 = vector.extract_strided_slice %0 {offsets = [0, 9], sizes = [8, 1], strides = [1, 1]} : vector<8x20xf32> to vector<8x1xf32>
    %109 = vector.broadcast %108 : vector<8x1xf32> to vector<8x256xf32>
    %110 = arith.mulf %109, %107 : vector<8x256xf32>
    %111 = arith.addf %101, %110 : vector<8x256xf32>
    %112 = arith.mulf %92, %11 : vector<8x256xf32>
    %113 = vector.extract_strided_slice %0 {offsets = [0, 14], sizes = [8, 1], strides = [1, 1]} : vector<8x20xf32> to vector<8x1xf32>
    %114 = vector.broadcast %113 : vector<8x1xf32> to vector<8x256xf32>
    %115 = arith.mulf %114, %112 : vector<8x256xf32>
    %116 = arith.addf %106, %115 : vector<8x256xf32>
    %117 = arith.mulf %97, %11 : vector<8x256xf32>
    %118 = vector.extract_strided_slice %0 {offsets = [0, 19], sizes = [8, 1], strides = [1, 1]} : vector<8x20xf32> to vector<8x1xf32>
    %119 = vector.broadcast %118 : vector<8x1xf32> to vector<8x256xf32>
    %120 = arith.mulf %119, %117 : vector<8x256xf32>
    %121 = arith.addf %111, %120 : vector<8x256xf32>
    %122 = arith.addf %116, %121 : vector<8x256xf32>
    %c0_10 = arith.constant 0 : index
    %c0_11 = arith.constant 0 : index
    %123 = vector.load %arg4[%c0_10, %c0_11] : memref<8x256xf32, #tpu.memory_space<vmem>>, vector<8x256xf32>
    tpu.vector_store %arg4[%c0_10, %c0_11], %122 {strides = array<i32>} : memref<8x256xf32, #tpu.memory_space<vmem>>, vector<8x256xf32>,
    return
  }
  func.func @transform_0(%arg0: i32, %arg1: i32) -> (i32, i32) {
    %c0_i32 = arith.constant 0 : i32
    %c0_i32_0 = arith.constant 0 : i32
    return %arg0, %c0_i32 : i32, i32
  }
  func.func @transform_1(%arg0: i32, %arg1: i32) -> (i32, i32) {
    %c0_i32 = arith.constant 0 : i32
    return %arg0, %arg1 : i32, i32
  }
  func.func @transform_2(%arg0: i32, %arg1: i32) -> (i32, i32) {
    %c0_i32 = arith.constant 0 : i32
    return %arg0, %arg1 : i32, i32
  }
}

</mosaic_0001>

<bundles_post_ra>
// kernel: _kaf_forward_impl.1
= control target key start
LH: loop header
LB: loop body
LE: loop exit
PB: predicated region body
PF: predicated region fallthrough
CT: control target
= control target key end

     0   :  { %v320_v0 = vmov 10   ;;  %v321_v1 = vmov 0   ;;  %v322_v3 = vmov 15   ;;  %v323_v4 = vmov 5   ;;  %s430_s0 = inlined_call_operand.vmem [shape: f32[8,20], index: 0, kind: input, shape index: {}]   ;;  %s431_s1 = inlined_call_operand.vmem [shape: f32[8,256], index: 1, kind: input, shape index: {}]   ;;  %s432_s2 = inlined_call_operand.vmem [shape: f32[8,256], index: 2, kind: output, shape index: {}]  }
   0x1   :  { %281 = vset.pattern.permute.xlu1 %v320_v0  ;;  %279 = vset.pattern.permute.xlu0 %v321_v1  ;;  %v11_v2 = vld [vmem:[%s430_s0] sm:$0xff]  ;;  %v324_v5 = vmov 1   ;;  %v325_v6 = vmov 6   ;;  %v326_v7 = vmov 11   ;;  %v327_v8 = vmov 2   ;;  %v13_v22 = vld [vmem:[%s431_s1 + $0x8] sm:$0xff] }
   0x2   :  { %74 = vperm.xlu1 %281, %v11_v2   ;;  %62 = vperm.xlu0 %279, %v11_v2   ;;  %v328_v9 = vmov 16   ;;  %v329_v10 = vmov 17   ;;  %v330_v11 = vmov 7   ;;  %v331_v12 = vmov 13   ;;  %v12_v21 = vld [vmem:[%s431_s1] sm:$0xff] }
   0x3   :  { %v332_v13 = vmov 12   ;;  %v333_v14 = vmov 9   ;;  %v334_v15 = vmov 3   ;;  %v335_v16 = vmov 19  }
   0x4   :  { %v336_v17 = vmov 8   ;;  %v337_v18 = vmov 18   ;;  %v338_v19 = vmov 4   ;;  %v339_v20 = vmov 14  }
   0x5   :  { %v14_v23 = vmul.f32 -1.2534723, %v12_v21  ;;  %v15_v25 = vmul.f32 -1.2534723, %v13_v22  ;;  %v44_v27 = vmul.f32 0.39583334, %v12_v21 }
   0x6   :  { %282 = vset.pattern.permute.xlu1 %v322_v3  ;;  %280 = vset.pattern.permute.xlu0 %v323_v4  ;;  %v45_v29 = vmul.f32 0.39583334, %v13_v22  ;;  %v28_v31 = vmul.f32 -7.520834, %v12_v21  ;;  %v29_v32 = vmul.f32 -7.520834, %v13_v22 }
   0x7   :  { %82 = vperm.xlu1 %282, %v11_v2   ;;  %68 = vperm.xlu0 %280, %v11_v2   ;;  %v16_v26 = vmul.f32 %v14_v23, %v12_v21  ;;  %v17_v28 = vmul.f32 %v15_v25, %v13_v22  ;;  %v52_v34 = vmul.f32 4.354167, %v12_v21  ;;  %v18_v36 = vmul.f32 0.7916667, %v12_v21 }
   0x8   :  { %v19_v38 = vmul.f32 0.7916667, %v13_v22  ;;  %v36_v41 = vmul.f32 -3.5625002, %v12_v21  ;;  %v37_v44 = vmul.f32 -3.5625002, %v13_v22 }
   0x9   :  { %v46_v33 = vadd.f32 %v44_v27, %v16_v26  ;;  %v47_v35 = vadd.f32 %v45_v29, %v17_v28  ;;  %v30_v37 = vadd.f32 %v28_v31, %v16_v26  ;;  %v31_v40 = vadd.f32 %v29_v32, %v17_v28 }
   0xa   :  { %v54_v43 = vadd.f32 %v52_v34, %v16_v26  ;;  %v53_v46 = vmul.f32 4.354167, %v13_v22  ;;  %v257_v47 = vclamps-f32 %v18_v36, 80.0  ;;  %v258_v49 = vclamps-f32 %v19_v38, 80.0 }
   0xb   :  { %283 = vset.pattern.permute.xlu1 %v324_v5  ;;  %284 = vset.pattern.permute.xlu0 %v325_v6  ;;  %v48_v42 = vmul.f32 1.442695, %v46_v33  ;;  %v50_v45 = vmul.f32 1.442695, %v47_v35  ;;  %v32_v48 = vmul.f32 1.442695, %v30_v37  ;;  %v38_v51 = vadd.f32 %v36_v41, %v16_v26 }
   0xc   :  { %92 = vperm.xlu1 %283, %v11_v2   ;;  %102 = vperm.xlu0 %284, %v11_v2   ;;  %v34_v50 = vmul.f32 1.442695, %v31_v40  ;;  %v56_v53 = vmul.f32 1.442695, %v54_v43  ;;  %v39_v54 = vadd.f32 %v37_v44, %v17_v28  ;;  %v55_v55 = vadd.f32 %v53_v46, %v17_v28 }
   0xd   :  { %300 = vpow2.f32 %v48_v42  ;;  %v24_v56 = vmul.f32 1.442695, %v257_v47  ;;  %v26_v57 = vmul.f32 1.442695, %v258_v49  ;;  %v40_v58 = vmul.f32 1.442695, %v38_v51 }
   0xe   :  { %302 = vpow2.f32 %v50_v45  ;;  %v42_v59 = vmul.f32 1.442695, %v39_v54  ;;  %v58_v61 = vmul.f32 1.442695, %v55_v55 }
   0xf   :  { %304 = vpow2.f32 %v32_v48 }
  0x10   :  { %285 = vset.pattern.permute.xlu1 %v326_v7  ;;  %287 = vset.pattern.permute.xlu0 %v327_v8  ;;  %306 = vpow2.f32 %v34_v50 }
  0x11   :  { %112 = vperm.xlu1 %285, %v11_v2   ;;  %132 = vperm.xlu0 %287, %v11_v2   ;;  %308 = vpow2.f32 %v56_v53 }
  0x12   :  { %310 = vpow2.f32 %v24_v56 }
  0x13   :  { %312 = vpow2.f32 %v26_v57 }
  0x14   :  { %314 = vpow2.f32 %v40_v58 }
  0x15   :  { %286 = vset.pattern.permute.xlu1 %v328_v9  ;;  %290 = vset.pattern.permute.xlu0 %v329_v10  ;;  %316 = vpow2.f32 %v42_v59 }
  0x16   :  { %122 = vperm.xlu1 %286, %v11_v2   ;;  %162 = vperm.xlu0 %290, %v11_v2   ;;  %318 = vpow2.f32 %v58_v61 }
  0x17   :  { %v301_v0 = vpop.eup %300 }
  0x18   :  { %v303_v1 = vpop.eup %302 }
  0x1a   :  { %288 = vset.pattern.permute.xlu1 %v330_v11  ;;  %293 = vset.pattern.permute.xlu0 %v331_v12 }
  0x1b   :  { %142 = vperm.xlu1 %288, %v11_v2   ;;  %192 = vperm.xlu0 %293, %v11_v2  }
  0x1f   :  { %289 = vset.pattern.permute.xlu1 %v332_v13  ;;  %296 = vset.pattern.permute.xlu0 %v333_v14 }
  0x20   :  { %152 = vperm.xlu1 %289, %v11_v2   ;;  %222 = vperm.xlu0 %296, %v11_v2  }
  0x24   :  { %291 = vset.pattern.permute.xlu1 %v334_v15  ;;  %299 = vset.pattern.permute.xlu0 %v335_v16 }
  0x25   :  { %172 = vperm.xlu1 %291, %v11_v2  }
  0x29   :  { %292 = vset.pattern.permute.xlu1 %v336_v17 }
  0x2a   :  { %182 = vperm.xlu1 %292, %v11_v2  }
  0x2e   :  { %294 = vset.pattern.permute.xlu1 %v337_v18 }
  0x2f   :  { %202 = vperm.xlu1 %294, %v11_v2  }
  0x33   :  { %295 = vset.pattern.permute.xlu1 %v338_v19 }
  0x34   :  { %212 = vperm.xlu1 %295, %v11_v2  }
  0x38   :  { %297 = vset.pattern.permute.xlu1 %v339_v20 }
  0x39   :  { %232 = vperm.xlu1 %297, %v11_v2  }
  0x3d   :  { %298 = vset.pattern.permute.xlu1 %v335_v16 }
  0x3e   :  { %242 = vperm.xlu1 %298, %v11_v2   ;;  %v305_v2 = vpop.eup %304 }
  0x3f   :  { %v307_v3 = vpop.eup %306 }
  0x40   :  { %v309_v4 = vpop.eup %308 }
  0x41   :  { %v374_v6 = vpop.eup %310 }
  0x42   :  { %v376_v8 = vpop.eup %312  ;;  %v89_v11 = vmul.f32 %v374_v6, %v305_v2  ;;  %v109_v16 = vmul.f32 %v374_v6, %v301_v0  ;;  %v119_v17 = vmul.f32 %v374_v6, %v309_v4 }
  0x43   :  { %v315_v9 = vpop.eup %314  ;;  %v90_v14 = vmul.f32 %v376_v8, %v307_v3  ;;  %v110_v19 = vmul.f32 %v376_v8, %v303_v1 }
  0x44   :  { %v317_v10 = vpop.eup %316  ;;  %v99_v12 = vmul.f32 %v315_v9, %v374_v6  ;;  %v129_v20 = vmul.f32 %v374_v6, %v89_v11  ;;  %v159_v27 = vmul.f32 %v374_v6, %v119_v17  ;;  %v149_v28 = vmul.f32 %v374_v6, %v109_v16 }
  0x45   :  { %v319_v13 = vpop.eup %318  ;;  %v100_v15 = vmul.f32 %v317_v10, %v376_v8  ;;  %v130_v25 = vmul.f32 %v376_v8, %v90_v14  ;;  %v150_v42 = vmul.f32 %v376_v8, %v110_v19 }
  0x46   :  { %v120_v21 = vmul.f32 %v319_v13, %v376_v8  ;;  %v139_v22 = vmul.f32 %v374_v6, %v99_v12  ;;  %v169_v46 = vmul.f32 %v374_v6, %v129_v20 }
  0x47   :  { %v140_v26 = vmul.f32 %v376_v8, %v100_v15  ;;  %v170_v47 = vmul.f32 %v376_v8, %v130_v25 }
  0x48   :  { %v160_v41 = vmul.f32 %v376_v8, %v120_v21 }
  0x81   :  { %v364_v24 = vpop.permute.xlu1 %74  ;;  %v63_v62 = vpop.permute.xlu0 %62 }
  0x82   :  { %v77_v34 = vmul.f32 %v301_v0, %v364_v24  ;;  %v78_v35 = vmul.f32 %v303_v1, %v364_v24  ;;  %v65_v36 = vmul.f32 %v305_v2, %v63_v62  ;;  %v66_v37 = vmul.f32 %v307_v3, %v63_v62 }
  0x83   :  { %v179_v0 = vmul.f32 %v374_v6, %v139_v22  ;;  %v180_v1 = vmul.f32 %v376_v8, %v140_v26 }
  0x84   :  { %v79_v51 = vadd.f32 %v77_v34, %v65_v36  ;;  %v80_v53 = vadd.f32 %v78_v35, %v66_v37 }
  0x86   :  { %v366_v30 = vpop.permute.xlu1 %82  ;;  %v69_v7 = vpop.permute.xlu0 %68 }
  0x87   :  { %v85_v29 = vmul.f32 %v309_v4, %v366_v30  ;;  %v86_v31 = vmul.f32 %v319_v13, %v366_v30  ;;  %v71_v32 = vmul.f32 %v315_v9, %v69_v7  ;;  %v72_v33 = vmul.f32 %v317_v10, %v69_v7 }
  0x88   :  { %v199_v4 = vmul.f32 %v374_v6, %v159_v27  ;;  %v200_v7 = vmul.f32 %v376_v8, %v160_v41 }
  0x89   :  { %v87_v48 = vadd.f32 %v85_v29, %v71_v32  ;;  %v88_v24 = vadd.f32 %v86_v31, %v72_v33 }
  0x8b   :  { %v368_v39 = vpop.permute.xlu1 %92  ;;  %v103_v23 = vpop.permute.xlu0 %102 }
  0x8c   :  { %v105_v38 = vmul.f32 %v103_v23, %v99_v12  ;;  %v106_v40 = vmul.f32 %v103_v23, %v100_v15  ;;  %v95_v44 = vmul.f32 %v368_v39, %v89_v11  ;;  %v96_v45 = vmul.f32 %v368_v39, %v90_v14 }
  0x8e   :  { %v107_v56 = vadd.f32 %v105_v38, %v87_v48  ;;  %v108_v57 = vadd.f32 %v106_v40, %v88_v24  ;;  %v97_v39 = vadd.f32 %v95_v44, %v79_v51  ;;  %v98_v61 = vadd.f32 %v96_v45, %v80_v53 }
  0x8f   :  { %v209_v38 = vmul.f32 %v374_v6, %v169_v46  ;;  %v210_v40 = vmul.f32 %v376_v8, %v170_v47 }
  0x90   :  { %v370_v52 = vpop.permute.xlu1 %112  ;;  %v133_v30 = vpop.permute.xlu0 %132 }
  0x91   :  { %v115_v54 = vmul.f32 %v370_v52, %v109_v16  ;;  %v116_v55 = vmul.f32 %v370_v52, %v110_v19  ;;  %v135_v10 = vmul.f32 %v133_v30, %v129_v20  ;;  %v136_v11 = vmul.f32 %v133_v30, %v130_v25 }
  0x92   :  { %v190_v19 = vmul.f32 %v376_v8, %v150_v42  ;;  %v220_v20 = vmul.f32 %v376_v8, %v180_v1 }
  0x93   :  { %v117_v9 = vadd.f32 %v115_v54, %v97_v39  ;;  %v118_v52 = vadd.f32 %v116_v55, %v98_v61 }
  0x94   :  { %v230_v44 = vmul.f32 %v376_v8, %v190_v19 }
  0x95   :  { %v123_v60 = vpop.permute.xlu1 %122  ;;  %v163_v62 = vpop.permute.xlu0 %162  ;;  %v137_v29 = vadd.f32 %v135_v10, %v117_v9  ;;  %v138_v31 = vadd.f32 %v136_v11, %v118_v52 }
  0x96   :  { %v125_v49 = vmul.f32 %v123_v60, %v119_v17  ;;  %v126_v50 = vmul.f32 %v123_v60, %v120_v21  ;;  %v165_v13 = vmul.f32 %v163_v62, %v159_v27  ;;  %v166_v14 = vmul.f32 %v163_v62, %v160_v41 }
  0x97   :  { %v189_v17 = vmul.f32 %v374_v6, %v149_v28 }
  0x98   :  { %v127_v3 = vadd.f32 %v125_v49, %v107_v56  ;;  %v128_v60 = vadd.f32 %v126_v50, %v108_v57 }
  0x9a   :  { %v143_v63 = vpop.permute.xlu1 %142  ;;  %v193_v21 = vpop.permute.xlu0 %192 }
  0x9b   :  { %v145_v58 = vmul.f32 %v143_v63, %v139_v22  ;;  %v146_v59 = vmul.f32 %v143_v63, %v140_v26  ;;  %v219_v26 = vmul.f32 %v374_v6, %v179_v0  ;;  %v196_v48 = vmul.f32 %v193_v21, %v190_v19 }
  0x9d   :  { %v147_v12 = vadd.f32 %v145_v58, %v127_v3  ;;  %v148_v63 = vadd.f32 %v146_v59, %v128_v60 }
  0x9f   :  { %v372_v5 = vpop.permute.xlu1 %152  ;;  %v167_v33 = vadd.f32 %v165_v13, %v147_v12  ;;  %v223_v37 = vpop.permute.xlu0 %222 }
  0xa0   :  { %v155_v15 = vmul.f32 %v372_v5, %v149_v28  ;;  %v156_v16 = vmul.f32 %v372_v5, %v150_v42  ;;  %v168_v5 = vadd.f32 %v166_v14, %v148_v63  ;;  %v225_v51 = vmul.f32 %v223_v37, %v219_v26 }
  0xa1   :  { %v226_v53 = vmul.f32 %v223_v37, %v220_v20 }
  0xa2   :  { %v157_v35 = vadd.f32 %v155_v15, %v137_v29  ;;  %v158_v36 = vadd.f32 %v156_v16, %v138_v31 }
  0xa4   :  { %v384_v18 = vpop.permute.xlu1 %172 }
  0xa5   :  { %v175_v27 = vmul.f32 %v384_v18, %v169_v46  ;;  %v176_v32 = vmul.f32 %v384_v18, %v170_v47  ;;  %v195_v18 = vmul.f32 %v193_v21, %v189_v17  ;;  %v239_v46 = vmul.f32 %v374_v6, %v199_v4 }
  0xa6   :  { %v240_v47 = vmul.f32 %v376_v8, %v200_v7 }
  0xa7   :  { %v177_v45 = vadd.f32 %v175_v27, %v157_v35  ;;  %v178_v30 = vadd.f32 %v176_v32, %v158_v36 }
  0xa9   :  { %v183_v43 = vpop.permute.xlu1 %182  ;;  %v197_v56 = vadd.f32 %v195_v18, %v177_v45  ;;  %v198_v57 = vadd.f32 %v196_v48, %v178_v30 }
  0xaa   :  { %v185_v22 = vmul.f32 %v183_v43, %v179_v0  ;;  %v186_v23 = vmul.f32 %v183_v43, %v180_v1  ;;  %v229_v43 = vmul.f32 %v374_v6, %v189_v17 }
  0xac   :  { %v187_v41 = vadd.f32 %v185_v22, %v167_v33  ;;  %v188_v42 = vadd.f32 %v186_v23, %v168_v5 }
  0xae   :  { %v203_v2 = vpop.permute.xlu1 %202 }
  0xaf   :  { %v205_v34 = vmul.f32 %v203_v2, %v199_v4  ;;  %v206_v28 = vmul.f32 %v203_v2, %v200_v7 }
  0xb1   :  { %v207_v49 = vadd.f32 %v205_v34, %v187_v41  ;;  %v208_v50 = vadd.f32 %v206_v28, %v188_v42 }
  0xb3   :  { %v213_v25 = vpop.permute.xlu1 %212  ;;  %v227_v39 = vadd.f32 %v225_v51, %v207_v49  ;;  %v228_v61 = vadd.f32 %v226_v53, %v208_v50 }
  0xb4   :  { %v215_v54 = vmul.f32 %v213_v25, %v209_v38  ;;  %v216_v55 = vmul.f32 %v213_v25, %v210_v40 }
  0xb6   :  { %v217_v0 = vadd.f32 %v215_v54, %v197_v56  ;;  %v218_v1 = vadd.f32 %v216_v55, %v198_v57 }
  0xb8   :  { %v233_v24 = vpop.permute.xlu1 %232 }
  0xb9   :  { %v235_v58 = vmul.f32 %v233_v24, %v229_v43  ;;  %v236_v59 = vmul.f32 %v233_v24, %v230_v44 }
  0xbb   :  { %v237_v60 = vadd.f32 %v235_v58, %v217_v0  ;;  %v238_v9 = vadd.f32 %v236_v59, %v218_v1 }
  0xbd   :  { %v243_v62 = vpop.permute.xlu1 %242 }
  0xbe   :  { %v245_v2 = vmul.f32 %v243_v62, %v239_v46  ;;  %v246_v3 = vmul.f32 %v243_v62, %v240_v47 }
  0xc0   :  { %v247_v52 = vadd.f32 %v245_v2, %v227_v39  ;;  %v248_v10 = vadd.f32 %v246_v3, %v228_v61 }
  0xc2   :  { %v249_v11 = vadd.f32 %v247_v52, %v237_v60  ;;  %v250_v12 = vadd.f32 %v248_v10, %v238_v9 }
  0xc4   :  { %251 = vst [vmem:[%s432_s2] sm:$0xff] %v249_v11  ;;  %252 = vst [vmem:[%s432_s2 + $0x8] sm:$0xff] %v250_v12 }

</bundles_post_ra>
